<compile_context>
chip_gen: v6e
topology: v6e:2x2x1
jax: 0.10.0
libtpu: 0.0.40
codegen_flags: <defaults>
</compile_context>

<pallas_src>
import functools

import jax
import jax.numpy as jnp
from jax import lax
from jax.experimental import pallas as pl
from jax.experimental.pallas import tpu as pltpu

EPS = 1e-12
GATHER_UNROLL = 8   # row DMAs issued per loop iteration (amortizes loop cost)


def _round_up(x, m):
    return (x + m - 1) // m * m


def bert_embeddings_kernel(
    ids_ref,    # scalar prefetch: (B, S_pad) int32 in SMEM
    word_hbm,   # (V, H) word-embedding table left in HBM (pl.ANY)
    pos_ref,    # (ts, H) position-embedding tile (VMEM, constant across batch)
    tt_ref,     # (ts, 1) int32 token-type ids tile (VMEM)
    type_ref,   # (TV, H) token-type table, fully resident (VMEM)
    gb_ref,     # (2, H) packed LayerNorm gamma/beta, f32 (VMEM)
    o_ref,      # (ts, H) output tile
    wbuf,       # (ts, H) word-row gather scratch (whole-tile prefetch)
    sems,       # (GATHER_UNROLL,) DMA semaphores
):
    s = pl.program_id(0)
    b = pl.program_id(1)
    rows, hid = o_ref.shape
    n_groups = rows // GATHER_UNROLL
    s0 = pl.multiple_of(s * rows, GATHER_UNROLL)

    # ---- Phase 1: fire ALL `rows` word-row gathers (everything in flight). ----
    @pl.loop(0, n_groups)
    def _issue(g):
        base = pl.multiple_of(g * GATHER_UNROLL, GATHER_UNROLL)
        for u in range(GATHER_UNROLL):          # static unroll
            row = ids_ref[b, s0 + base + u]
            pltpu.make_async_copy(
                word_hbm.at[pl.ds(row, 1), :],
                wbuf.at[pl.ds(base + u, 1), :],
                sems.at[u],
            ).start()

    # ---- Phase 2: wait for every gather.  The descriptor only sets the
    # per-copy transfer size; all row copies are identically shaped, so a
    # fixed (row 0) descriptor is valid for the wait.
    @pl.loop(0, n_groups)
    def _drain(g):
        for u in range(GATHER_UNROLL):
            pltpu.make_async_copy(
                word_hbm.at[pl.ds(0, 1), :],
                wbuf.at[pl.ds(0, 1), :],
                sems.at[u],
            ).wait()

    # ---- Phase 3: one vectorized add + LayerNorm pass over the whole tile. ----
    x = wbuf[...].astype(jnp.float32)                       # word embeddings
    x = x + pos_ref[...].astype(jnp.float32)                # position embeddings

    tt = tt_ref[...]                                        # (rows, 1) int32
    type_tbl = type_ref[...].astype(jnp.float32)            # (TV, H)
    tv = type_tbl.shape[0]
    te = jnp.broadcast_to(type_tbl[tv - 1:tv, :], (rows, hid))
    for k in range(tv - 2, -1, -1):                         # select chain
        row_k = jnp.broadcast_to(type_tbl[k:k + 1, :], (rows, hid))
        te = jnp.where(tt == k, row_k, te)
    x = x + te

    # LayerNorm over the hidden axis (biased variance, eps=1e-12), f32 math.
    mean = jnp.mean(x, axis=-1, keepdims=True)
    cen = x - mean
    var = jnp.mean(cen * cen, axis=-1, keepdims=True)
    gamma = gb_ref[0:1, :]
    beta = gb_ref[1:2, :]
    y = cen * lax.rsqrt(var + EPS) * gamma + beta
    # TODO(synk): nn.Dropout is identity in eval mode; training-mode dropout
    # (PRNG mask + 1/(1-p) scale) is not implemented here.
    o_ref[...] = y.astype(o_ref.dtype)                      # one full-tile store


@functools.partial(jax.jit, static_argnames=("seq_tile",))
def bert_embeddings(input_ids, token_type_ids, word_table, pos_table,
                    type_table, gamma, beta, *, seq_tile=1024):
    """input_ids/token_type_ids: [B, S] int; tables: [V,H], [P,H], [TV,H]."""
    B, S = input_ids.shape
    V, H = word_table.shape
    TV = type_table.shape[0]
    dtype = word_table.dtype
    itemsize = jnp.dtype(dtype).itemsize
    pos_itemsize = jnp.dtype(pos_table.dtype).itemsize

    # Sequence tile: large by default (amortize pipeline overhead), clamped so
    # the VMEM footprint (incl. f32 LayerNorm intermediates) stays well under
    # v7x's 64 MiB physical VMEM.
    ts = _round_up(min(seq_tile, S), GATHER_UNROLL)

    def _vmem_estimate(t):
        return (t * H * itemsize            # word-gather scratch
                + 2 * t * H * itemsize      # output double buffer
                + 2 * t * H * pos_itemsize  # position tile double buffer
                + 2 * t * 128 * 4           # token-type ids tile (lane padded)
                + 8 * t * H * 4             # f32 LayerNorm intermediates
                + (TV + 2) * H * 4)         # resident type table + gamma/beta

    while ts > GATHER_UNROLL and _vmem_estimate(ts) > (48 << 20):
        ts = _round_up(ts // 2, GATHER_UNROLL)

    S_pad = _round_up(S, ts)

    # Pad to the tile boundary (id 0 is a safe gather row; padded rows are
    # sliced off at the end).
    ids = jnp.zeros((B, S_pad), jnp.int32).at[:, :S].set(input_ids.astype(jnp.int32))
    tt = jnp.zeros((B, S_pad, 1), jnp.int32).at[:, :S, 0].set(
        token_type_ids.astype(jnp.int32))
    pos = jnp.zeros((S_pad, H), pos_table.dtype).at[:S, :].set(pos_table[:S])
    gb = jnp.stack([gamma, beta]).astype(jnp.float32)   # LN params kept in f32

    grid = (S_pad // ts, B)   # batch innermost -> pos tile reused across batch

    vmem_limit = int(min(max(_vmem_estimate(ts) + (8 << 20), 32 << 20), 56 << 20))

    cost = pl.CostEstimate(
        flops=int(10 * B * S_pad * H),
        transcendentals=int(B * S_pad),
        bytes_accessed=int(2 * B * S_pad * H * itemsize + S_pad * H * pos_itemsize),
    )

    out = pl.pallas_call(
        bert_embeddings_kernel,
        out_shape=jax.ShapeDtypeStruct((B, S_pad, H), dtype),
        grid_spec=pltpu.PrefetchScalarGridSpec(
            num_scalar_prefetch=1,
            grid=grid,
            in_specs=[
                pl.BlockSpec(memory_space=pl.ANY),                         # word table (HBM)
                pl.BlockSpec((ts, H), lambda s, b, ids: (s, 0)),           # position tile
                pl.BlockSpec((None, ts, 1), lambda s, b, ids: (b, s, 0)),  # token-type ids
                pl.BlockSpec((TV, H), lambda s, b, ids: (0, 0)),           # token-type table
                pl.BlockSpec((2, H), lambda s, b, ids: (0, 0)),            # gamma/beta (f32)
            ],
            out_specs=pl.BlockSpec((None, ts, H), lambda s, b, ids: (b, s, 0)),
            scratch_shapes=[
                pltpu.VMEM((ts, H), dtype),
                pltpu.SemaphoreType.DMA((GATHER_UNROLL,)),
            ],
        ),
        compiler_params=pltpu.CompilerParams(
            dimension_semantics=("parallel", "parallel"),
            vmem_limit_bytes=vmem_limit,
        ),
        cost_estimate=cost,
    )(ids, word_table, pos, tt, type_table, gb)

    return out[:, :S, :]


def reference(input_ids, token_type_ids, word_table, pos_table, type_table,
              gamma, beta):
    B, S = input_ids.shape
    we = jnp.take(word_table, input_ids, axis=0)
    pe = pos_table[:S][None, :, :]
    te = jnp.take(type_table, token_type_ids, axis=0)
    x = we + pe + te
    mean = jnp.mean(x, axis=-1, keepdims=True)
    var = jnp.mean((x - mean) ** 2, axis=-1, keepdims=True)
    return (x - mean) / jnp.sqrt(var + EPS) * gamma + beta


if __name__ == "__main__":
    # Small BERT-like config.
    batch, seq = 2, 24
    hidden_size = 128
    vocab_size = 1000
    max_position_embeddings = 64
    type_vocab_size = 2

    key = jax.random.PRNGKey(0)
    k1, k2, k3, k4, k5, k6, k7 = jax.random.split(key, 7)

    input_ids = jax.random.randint(k1, (batch, seq), 0, vocab_size, dtype=jnp.int32)
    token_type_ids = jax.random.randint(k2, (batch, seq), 0, type_vocab_size,
                                        dtype=jnp.int32)
    word_table = jax.random.normal(k3, (vocab_size, hidden_size), jnp.float32) * 0.02
    pos_table = jax.random.normal(k4, (max_position_embeddings, hidden_size),
                                  jnp.float32) * 0.02
    type_table = jax.random.normal(k5, (type_vocab_size, hidden_size),
                                   jnp.float32) * 0.02
    gamma = 1.0 + 0.1 * jax.random.normal(k6, (hidden_size,), jnp.float32)
    beta = 0.1 * jax.random.normal(k7, (hidden_size,), jnp.float32)
    # (dropout with hidden_dropout_prob is identity at inference time)

    # seq_tile=16 (< seq=24) exercises tiling, tail padding and the
    # whole-tile DMA gather path even at this small demo size.
    out = bert_embeddings(input_ids, token_type_ids, word_table, pos_table,
                          type_table, gamma, beta, seq_tile=16)
    jax.block_until_ready(out)

    ref = reference(input_ids, token_type_ids, word_table, pos_table,
                    type_table, gamma, beta)
    assert out.shape == ref.shape
    assert jnp.allclose(out, ref, atol=1e-4, rtol=1e-4), (
        f"max err {jnp.max(jnp.abs(out - ref))}"
    )
    print("KERNEL_OK")
</pallas_src>

<mosaic_0001>
module attributes {stable_mosaic.version = 11 : i64} {
  func.func @bert_embeddings_kernel(%arg0: i32, %arg1: i32, %arg2: memref<2x32xi32, #tpu.memory_space<smem>>, %arg3: memref<1000x128xf32, #tpu.memory_space<any>>, %arg4: memref<16x128xf32, #tpu.memory_space<vmem>>, %arg5: memref<1x16x1xi32, #tpu.memory_space<vmem>>, %arg6: memref<2x128xf32, #tpu.memory_space<vmem>>, %arg7: memref<2x128xf32, #tpu.memory_space<vmem>>, %arg8: memref<1x16x128xf32, #tpu.memory_space<vmem>>, %arg9: memref<16x128xf32, #tpu.memory_space<vmem>>, %arg10: memref<8x!tpu.dma_semaphore, #tpu.memory_space<semaphore_mem>>) attributes {dimension_semantics = [#tpu.dimension_semantics<parallel>, #tpu.dimension_semantics<parallel>], iteration_bounds = array<i64: 2, 2>, scalar_prefetch = 1 : i64, scratch_operands = 2 : i64, tpu.core_type = #tpu.core_type<tc>, window_params = [{}, {transform_indices = @transform_1, window_bounds = array<i64: 16, 128>}, {transform_indices = @transform_2, window_bounds = array<i64: 1, 16, 1>}, {pipeline_mode = #tpu.pipeline_mode<synchronous>, transform_indices = @transform_3, window_bounds = array<i64: 2, 128>}, {pipeline_mode = #tpu.pipeline_mode<synchronous>, transform_indices = @transform_4, window_bounds = array<i64: 2, 128>}, {transform_indices = @transform_5, window_bounds = array<i64: 1, 16, 128>}]} {
    %c16_i32 = arith.constant 16 : i32
    %0 = arith.muli %arg0, %c16_i32 : i32
    %1 = tpu.assume_multiple %0, 8 : i32
    %c0_i32 = arith.constant 0 : i32
    %c2_i32 = arith.constant 2 : i32
    %2 = arith.addi %c0_i32, %c2_i32 : i32
    %c1_i32 = arith.constant 1 : i32
    scf.for %arg11 = %c0_i32 to %2 step %c1_i32  : i32 {
      %c1_i32_23 = arith.constant 1 : i32
      %47 = arith.muli %arg11, %c1_i32_23 : i32
      %c0_i32_24 = arith.constant 0 : i32
      %48 = arith.addi %c0_i32_24, %47 : i32
      %c8_i32 = arith.constant 8 : i32
      %49 = arith.muli %48, %c8_i32 : i32
      %50 = tpu.assume_multiple %49, 8 : i32
      %51 = arith.addi %1, %50 : i32
      %c0_i32_25 = arith.constant 0 : i32
      %52 = arith.addi %51, %c0_i32_25 : i32
      %53 = arith.index_cast %arg1 : i32 to index
      %54 = arith.index_cast %52 : i32 to index
      %55 = memref.load %arg2[%53, %54] : memref<2x32xi32, #tpu.memory_space<smem>>
      %c0_i32_26 = arith.constant 0 : i32
      %56 = arith.addi %50, %c0_i32_26 : i32
      %c0_i32_27 = arith.constant 0 : i32
      %c0_i32_28 = arith.constant 0 : i32
      %57 = tpu.memref_slice %arg3[%55, %c0_i32_28] : memref<1000x128xf32, #tpu.memory_space<any>> -> memref<1x128xf32, #tpu.memory_space<any>>
      %c0_i32_29 = arith.constant 0 : i32
      %58 = tpu.memref_slice %arg9[%56, %c0_i32_29] : memref<16x128xf32, #tpu.memory_space<vmem>> -> memref<1x128xf32, #tpu.memory_space<vmem>>
      %59 = tpu.memref_slice %arg10[%c0_i32_27] : memref<8x!tpu.dma_semaphore, #tpu.memory_space<semaphore_mem>> -> memref<1x!tpu.dma_semaphore, #tpu.memory_space<semaphore_mem>>
      %60 = tpu.memref_squeeze %59 : memref<1x!tpu.dma_semaphore, #tpu.memory_space<semaphore_mem>> -> memref<!tpu.dma_semaphore, #tpu.memory_space<semaphore_mem>>
      tpu.enqueue_dma source(%57 : memref<1x128xf32, #tpu.memory_space<any>>) target(%58 : memref<1x128xf32, #tpu.memory_space<vmem>>) target_semaphore(%60 : memref<!tpu.dma_semaphore, #tpu.memory_space<semaphore_mem>>)
      %61 = arith.addi %1, %50 : i32
      %c1_i32_30 = arith.constant 1 : i32
      %62 = arith.addi %61, %c1_i32_30 : i32
      %63 = arith.index_cast %arg1 : i32 to index
      %64 = arith.index_cast %62 : i32 to index
      %65 = memref.load %arg2[%63, %64] : memref<2x32xi32, #tpu.memory_space<smem>>
      %c1_i32_31 = arith.constant 1 : i32
      %66 = arith.addi %50, %c1_i32_31 : i32
      %c1_i32_32 = arith.constant 1 : i32
      %c0_i32_33 = arith.constant 0 : i32
      %67 = tpu.memref_slice %arg3[%65, %c0_i32_33] : memref<1000x128xf32, #tpu.memory_space<any>> -> memref<1x128xf32, #tpu.memory_space<any>>
      %c0_i32_34 = arith.constant 0 : i32
      %68 = tpu.memref_slice %arg9[%66, %c0_i32_34] : memref<16x128xf32, #tpu.memory_space<vmem>> -> memref<1x128xf32, #tpu.memory_space<vmem>>
      %69 = tpu.memref_slice %arg10[%c1_i32_32] : memref<8x!tpu.dma_semaphore, #tpu.memory_space<semaphore_mem>> -> memref<1x!tpu.dma_semaphore, #tpu.memory_space<semaphore_mem>>
      %70 = tpu.memref_squeeze %69 : memref<1x!tpu.dma_semaphore, #tpu.memory_space<semaphore_mem>> -> memref<!tpu.dma_semaphore, #tpu.memory_space<semaphore_mem>>
      tpu.enqueue_dma source(%67 : memref<1x128xf32, #tpu.memory_space<any>>) target(%68 : memref<1x128xf32, #tpu.memory_space<vmem>>) target_semaphore(%70 : memref<!tpu.dma_semaphore, #tpu.memory_space<semaphore_mem>>)
      %71 = arith.addi %1, %50 : i32
      %c2_i32_35 = arith.constant 2 : i32
      %72 = arith.addi %71, %c2_i32_35 : i32
      %73 = arith.index_cast %arg1 : i32 to index
      %74 = arith.index_cast %72 : i32 to index
      %75 = memref.load %arg2[%73, %74] : memref<2x32xi32, #tpu.memory_space<smem>>
      %c2_i32_36 = arith.constant 2 : i32
      %76 = arith.addi %50, %c2_i32_36 : i32
      %c2_i32_37 = arith.constant 2 : i32
      %c0_i32_38 = arith.constant 0 : i32
      %77 = tpu.memref_slice %arg3[%75, %c0_i32_38] : memref<1000x128xf32, #tpu.memory_space<any>> -> memref<1x128xf32, #tpu.memory_space<any>>
      %c0_i32_39 = arith.constant 0 : i32
      %78 = tpu.memref_slice %arg9[%76, %c0_i32_39] : memref<16x128xf32, #tpu.memory_space<vmem>> -> memref<1x128xf32, #tpu.memory_space<vmem>>
      %79 = tpu.memref_slice %arg10[%c2_i32_37] : memref<8x!tpu.dma_semaphore, #tpu.memory_space<semaphore_mem>> -> memref<1x!tpu.dma_semaphore, #tpu.memory_space<semaphore_mem>>
      %80 = tpu.memref_squeeze %79 : memref<1x!tpu.dma_semaphore, #tpu.memory_space<semaphore_mem>> -> memref<!tpu.dma_semaphore, #tpu.memory_space<semaphore_mem>>
      tpu.enqueue_dma source(%77 : memref<1x128xf32, #tpu.memory_space<any>>) target(%78 : memref<1x128xf32, #tpu.memory_space<vmem>>) target_semaphore(%80 : memref<!tpu.dma_semaphore, #tpu.memory_space<semaphore_mem>>)
      %81 = arith.addi %1, %50 : i32
      %c3_i32 = arith.constant 3 : i32
      %82 = arith.addi %81, %c3_i32 : i32
      %83 = arith.index_cast %arg1 : i32 to index
      %84 = arith.index_cast %82 : i32 to index
      %85 = memref.load %arg2[%83, %84] : memref<2x32xi32, #tpu.memory_space<smem>>
      %c3_i32_40 = arith.constant 3 : i32
      %86 = arith.addi %50, %c3_i32_40 : i32
      %c3_i32_41 = arith.constant 3 : i32
      %c0_i32_42 = arith.constant 0 : i32
      %87 = tpu.memref_slice %arg3[%85, %c0_i32_42] : memref<1000x128xf32, #tpu.memory_space<any>> -> memref<1x128xf32, #tpu.memory_space<any>>
      %c0_i32_43 = arith.constant 0 : i32
      %88 = tpu.memref_slice %arg9[%86, %c0_i32_43] : memref<16x128xf32, #tpu.memory_space<vmem>> -> memref<1x128xf32, #tpu.memory_space<vmem>>
      %89 = tpu.memref_slice %arg10[%c3_i32_41] : memref<8x!tpu.dma_semaphore, #tpu.memory_space<semaphore_mem>> -> memref<1x!tpu.dma_semaphore, #tpu.memory_space<semaphore_mem>>
      %90 = tpu.memref_squeeze %89 : memref<1x!tpu.dma_semaphore, #tpu.memory_space<semaphore_mem>> -> memref<!tpu.dma_semaphore, #tpu.memory_space<semaphore_mem>>
      tpu.enqueue_dma source(%87 : memref<1x128xf32, #tpu.memory_space<any>>) target(%88 : memref<1x128xf32, #tpu.memory_space<vmem>>) target_semaphore(%90 : memref<!tpu.dma_semaphore, #tpu.memory_space<semaphore_mem>>)
      %91 = arith.addi %1, %50 : i32
      %c4_i32 = arith.constant 4 : i32
      %92 = arith.addi %91, %c4_i32 : i32
      %93 = arith.index_cast %arg1 : i32 to index
      %94 = arith.index_cast %92 : i32 to index
      %95 = memref.load %arg2[%93, %94] : memref<2x32xi32, #tpu.memory_space<smem>>
      %c4_i32_44 = arith.constant 4 : i32
      %96 = arith.addi %50, %c4_i32_44 : i32
      %c4_i32_45 = arith.constant 4 : i32
      %c0_i32_46 = arith.constant 0 : i32
      %97 = tpu.memref_slice %arg3[%95, %c0_i32_46] : memref<1000x128xf32, #tpu.memory_space<any>> -> memref<1x128xf32, #tpu.memory_space<any>>
      %c0_i32_47 = arith.constant 0 : i32
      %98 = tpu.memref_slice %arg9[%96, %c0_i32_47] : memref<16x128xf32, #tpu.memory_space<vmem>> -> memref<1x128xf32, #tpu.memory_space<vmem>>
      %99 = tpu.memref_slice %arg10[%c4_i32_45] : memref<8x!tpu.dma_semaphore, #tpu.memory_space<semaphore_mem>> -> memref<1x!tpu.dma_semaphore, #tpu.memory_space<semaphore_mem>>
      %100 = tpu.memref_squeeze %99 : memref<1x!tpu.dma_semaphore, #tpu.memory_space<semaphore_mem>> -> memref<!tpu.dma_semaphore, #tpu.memory_space<semaphore_mem>>
      tpu.enqueue_dma source(%97 : memref<1x128xf32, #tpu.memory_space<any>>) target(%98 : memref<1x128xf32, #tpu.memory_space<vmem>>) target_semaphore(%100 : memref<!tpu.dma_semaphore, #tpu.memory_space<semaphore_mem>>)
      %101 = arith.addi %1, %50 : i32
      %c5_i32 = arith.constant 5 : i32
      %102 = arith.addi %101, %c5_i32 : i32
      %103 = arith.index_cast %arg1 : i32 to index
      %104 = arith.index_cast %102 : i32 to index
      %105 = memref.load %arg2[%103, %104] : memref<2x32xi32, #tpu.memory_space<smem>>
      %c5_i32_48 = arith.constant 5 : i32
      %106 = arith.addi %50, %c5_i32_48 : i32
      %c5_i32_49 = arith.constant 5 : i32
      %c0_i32_50 = arith.constant 0 : i32
      %107 = tpu.memref_slice %arg3[%105, %c0_i32_50] : memref<1000x128xf32, #tpu.memory_space<any>> -> memref<1x128xf32, #tpu.memory_space<any>>
      %c0_i32_51 = arith.constant 0 : i32
      %108 = tpu.memref_slice %arg9[%106, %c0_i32_51] : memref<16x128xf32, #tpu.memory_space<vmem>> -> memref<1x128xf32, #tpu.memory_space<vmem>>
      %109 = tpu.memref_slice %arg10[%c5_i32_49] : memref<8x!tpu.dma_semaphore, #tpu.memory_space<semaphore_mem>> -> memref<1x!tpu.dma_semaphore, #tpu.memory_space<semaphore_mem>>
      %110 = tpu.memref_squeeze %109 : memref<1x!tpu.dma_semaphore, #tpu.memory_space<semaphore_mem>> -> memref<!tpu.dma_semaphore, #tpu.memory_space<semaphore_mem>>
      tpu.enqueue_dma source(%107 : memref<1x128xf32, #tpu.memory_space<any>>) target(%108 : memref<1x128xf32, #tpu.memory_space<vmem>>) target_semaphore(%110 : memref<!tpu.dma_semaphore, #tpu.memory_space<semaphore_mem>>)
      %111 = arith.addi %1, %50 : i32
      %c6_i32 = arith.constant 6 : i32
      %112 = arith.addi %111, %c6_i32 : i32
      %113 = arith.index_cast %arg1 : i32 to index
      %114 = arith.index_cast %112 : i32 to index
      %115 = memref.load %arg2[%113, %114] : memref<2x32xi32, #tpu.memory_space<smem>>
      %c6_i32_52 = arith.constant 6 : i32
      %116 = arith.addi %50, %c6_i32_52 : i32
      %c6_i32_53 = arith.constant 6 : i32
      %c0_i32_54 = arith.constant 0 : i32
      %117 = tpu.memref_slice %arg3[%115, %c0_i32_54] : memref<1000x128xf32, #tpu.memory_space<any>> -> memref<1x128xf32, #tpu.memory_space<any>>
      %c0_i32_55 = arith.constant 0 : i32
      %118 = tpu.memref_slice %arg9[%116, %c0_i32_55] : memref<16x128xf32, #tpu.memory_space<vmem>> -> memref<1x128xf32, #tpu.memory_space<vmem>>
      %119 = tpu.memref_slice %arg10[%c6_i32_53] : memref<8x!tpu.dma_semaphore, #tpu.memory_space<semaphore_mem>> -> memref<1x!tpu.dma_semaphore, #tpu.memory_space<semaphore_mem>>
      %120 = tpu.memref_squeeze %119 : memref<1x!tpu.dma_semaphore, #tpu.memory_space<semaphore_mem>> -> memref<!tpu.dma_semaphore, #tpu.memory_space<semaphore_mem>>
      tpu.enqueue_dma source(%117 : memref<1x128xf32, #tpu.memory_space<any>>) target(%118 : memref<1x128xf32, #tpu.memory_space<vmem>>) target_semaphore(%120 : memref<!tpu.dma_semaphore, #tpu.memory_space<semaphore_mem>>)
      %121 = arith.addi %1, %50 : i32
      %c7_i32 = arith.constant 7 : i32
      %122 = arith.addi %121, %c7_i32 : i32
      %123 = arith.index_cast %arg1 : i32 to index
      %124 = arith.index_cast %122 : i32 to index
      %125 = memref.load %arg2[%123, %124] : memref<2x32xi32, #tpu.memory_space<smem>>
      %c7_i32_56 = arith.constant 7 : i32
      %126 = arith.addi %50, %c7_i32_56 : i32
      %c7_i32_57 = arith.constant 7 : i32
      %c0_i32_58 = arith.constant 0 : i32
      %127 = tpu.memref_slice %arg3[%125, %c0_i32_58] : memref<1000x128xf32, #tpu.memory_space<any>> -> memref<1x128xf32, #tpu.memory_space<any>>
      %c0_i32_59 = arith.constant 0 : i32
      %128 = tpu.memref_slice %arg9[%126, %c0_i32_59] : memref<16x128xf32, #tpu.memory_space<vmem>> -> memref<1x128xf32, #tpu.memory_space<vmem>>
      %129 = tpu.memref_slice %arg10[%c7_i32_57] : memref<8x!tpu.dma_semaphore, #tpu.memory_space<semaphore_mem>> -> memref<1x!tpu.dma_semaphore, #tpu.memory_space<semaphore_mem>>
      %130 = tpu.memref_squeeze %129 : memref<1x!tpu.dma_semaphore, #tpu.memory_space<semaphore_mem>> -> memref<!tpu.dma_semaphore, #tpu.memory_space<semaphore_mem>>
      tpu.enqueue_dma source(%127 : memref<1x128xf32, #tpu.memory_space<any>>) target(%128 : memref<1x128xf32, #tpu.memory_space<vmem>>) target_semaphore(%130 : memref<!tpu.dma_semaphore, #tpu.memory_space<semaphore_mem>>)
    }
    %c2_i32_0 = arith.constant 2 : i32
    %c0_i32_1 = arith.constant 0 : i32
    %c2_i32_2 = arith.constant 2 : i32
    %3 = arith.addi %c0_i32_1, %c2_i32_2 : i32
    %c1_i32_3 = arith.constant 1 : i32
    scf.for %arg11 = %c0_i32_1 to %3 step %c1_i32_3  : i32 {
      %c0_i32_23 = arith.constant 0 : i32
      %c0_i32_24 = arith.constant 0 : i32
      %c0_i32_25 = arith.constant 0 : i32
      %47 = tpu.memref_slice %arg3[%c0_i32_24, %c0_i32_25] : memref<1000x128xf32, #tpu.memory_space<any>> -> memref<1x128xf32, #tpu.memory_space<any>>
      %c0_i32_26 = arith.constant 0 : i32
      %c0_i32_27 = arith.constant 0 : i32
      %48 = tpu.memref_slice %arg9[%c0_i32_26, %c0_i32_27] : memref<16x128xf32, #tpu.memory_space<vmem>> -> memref<1x128xf32, #tpu.memory_space<vmem>>
      %49 = tpu.memref_slice %arg10[%c0_i32_23] : memref<8x!tpu.dma_semaphore, #tpu.memory_space<semaphore_mem>> -> memref<1x!tpu.dma_semaphore, #tpu.memory_space<semaphore_mem>>
      %50 = tpu.memref_squeeze %49 : memref<1x!tpu.dma_semaphore, #tpu.memory_space<semaphore_mem>> -> memref<!tpu.dma_semaphore, #tpu.memory_space<semaphore_mem>>
      tpu.wait_dma2 semaphore(%50 : memref<!tpu.dma_semaphore, #tpu.memory_space<semaphore_mem>>) src(%47 : memref<1x128xf32, #tpu.memory_space<any>>) dst(%48 : memref<1x128xf32, #tpu.memory_space<vmem>>)
      %c1_i32_28 = arith.constant 1 : i32
      %c0_i32_29 = arith.constant 0 : i32
      %c0_i32_30 = arith.constant 0 : i32
      %51 = tpu.memref_slice %arg3[%c0_i32_29, %c0_i32_30] : memref<1000x128xf32, #tpu.memory_space<any>> -> memref<1x128xf32, #tpu.memory_space<any>>
      %c0_i32_31 = arith.constant 0 : i32
      %c0_i32_32 = arith.constant 0 : i32
      %52 = tpu.memref_slice %arg9[%c0_i32_31, %c0_i32_32] : memref<16x128xf32, #tpu.memory_space<vmem>> -> memref<1x128xf32, #tpu.memory_space<vmem>>
      %53 = tpu.memref_slice %arg10[%c1_i32_28] : memref<8x!tpu.dma_semaphore, #tpu.memory_space<semaphore_mem>> -> memref<1x!tpu.dma_semaphore, #tpu.memory_space<semaphore_mem>>
      %54 = tpu.memref_squeeze %53 : memref<1x!tpu.dma_semaphore, #tpu.memory_space<semaphore_mem>> -> memref<!tpu.dma_semaphore, #tpu.memory_space<semaphore_mem>>
      tpu.wait_dma2 semaphore(%54 : memref<!tpu.dma_semaphore, #tpu.memory_space<semaphore_mem>>) src(%51 : memref<1x128xf32, #tpu.memory_space<any>>) dst(%52 : memref<1x128xf32, #tpu.memory_space<vmem>>)
      %c2_i32_33 = arith.constant 2 : i32
      %c0_i32_34 = arith.constant 0 : i32
      %c0_i32_35 = arith.constant 0 : i32
      %55 = tpu.memref_slice %arg3[%c0_i32_34, %c0_i32_35] : memref<1000x128xf32, #tpu.memory_space<any>> -> memref<1x128xf32, #tpu.memory_space<any>>
      %c0_i32_36 = arith.constant 0 : i32
      %c0_i32_37 = arith.constant 0 : i32
      %56 = tpu.memref_slice %arg9[%c0_i32_36, %c0_i32_37] : memref<16x128xf32, #tpu.memory_space<vmem>> -> memref<1x128xf32, #tpu.memory_space<vmem>>
      %57 = tpu.memref_slice %arg10[%c2_i32_33] : memref<8x!tpu.dma_semaphore, #tpu.memory_space<semaphore_mem>> -> memref<1x!tpu.dma_semaphore, #tpu.memory_space<semaphore_mem>>
      %58 = tpu.memref_squeeze %57 : memref<1x!tpu.dma_semaphore, #tpu.memory_space<semaphore_mem>> -> memref<!tpu.dma_semaphore, #tpu.memory_space<semaphore_mem>>
      tpu.wait_dma2 semaphore(%58 : memref<!tpu.dma_semaphore, #tpu.memory_space<semaphore_mem>>) src(%55 : memref<1x128xf32, #tpu.memory_space<any>>) dst(%56 : memref<1x128xf32, #tpu.memory_space<vmem>>)
      %c3_i32 = arith.constant 3 : i32
      %c0_i32_38 = arith.constant 0 : i32
      %c0_i32_39 = arith.constant 0 : i32
      %59 = tpu.memref_slice %arg3[%c0_i32_38, %c0_i32_39] : memref<1000x128xf32, #tpu.memory_space<any>> -> memref<1x128xf32, #tpu.memory_space<any>>
      %c0_i32_40 = arith.constant 0 : i32
      %c0_i32_41 = arith.constant 0 : i32
      %60 = tpu.memref_slice %arg9[%c0_i32_40, %c0_i32_41] : memref<16x128xf32, #tpu.memory_space<vmem>> -> memref<1x128xf32, #tpu.memory_space<vmem>>
      %61 = tpu.memref_slice %arg10[%c3_i32] : memref<8x!tpu.dma_semaphore, #tpu.memory_space<semaphore_mem>> -> memref<1x!tpu.dma_semaphore, #tpu.memory_space<semaphore_mem>>
      %62 = tpu.memref_squeeze %61 : memref<1x!tpu.dma_semaphore, #tpu.memory_space<semaphore_mem>> -> memref<!tpu.dma_semaphore, #tpu.memory_space<semaphore_mem>>
      tpu.wait_dma2 semaphore(%62 : memref<!tpu.dma_semaphore, #tpu.memory_space<semaphore_mem>>) src(%59 : memref<1x128xf32, #tpu.memory_space<any>>) dst(%60 : memref<1x128xf32, #tpu.memory_space<vmem>>)
      %c4_i32 = arith.constant 4 : i32
      %c0_i32_42 = arith.constant 0 : i32
      %c0_i32_43 = arith.constant 0 : i32
      %63 = tpu.memref_slice %arg3[%c0_i32_42, %c0_i32_43] : memref<1000x128xf32, #tpu.memory_space<any>> -> memref<1x128xf32, #tpu.memory_space<any>>
      %c0_i32_44 = arith.constant 0 : i32
      %c0_i32_45 = arith.constant 0 : i32
      %64 = tpu.memref_slice %arg9[%c0_i32_44, %c0_i32_45] : memref<16x128xf32, #tpu.memory_space<vmem>> -> memref<1x128xf32, #tpu.memory_space<vmem>>
      %65 = tpu.memref_slice %arg10[%c4_i32] : memref<8x!tpu.dma_semaphore, #tpu.memory_space<semaphore_mem>> -> memref<1x!tpu.dma_semaphore, #tpu.memory_space<semaphore_mem>>
      %66 = tpu.memref_squeeze %65 : memref<1x!tpu.dma_semaphore, #tpu.memory_space<semaphore_mem>> -> memref<!tpu.dma_semaphore, #tpu.memory_space<semaphore_mem>>
      tpu.wait_dma2 semaphore(%66 : memref<!tpu.dma_semaphore, #tpu.memory_space<semaphore_mem>>) src(%63 : memref<1x128xf32, #tpu.memory_space<any>>) dst(%64 : memref<1x128xf32, #tpu.memory_space<vmem>>)
      %c5_i32 = arith.constant 5 : i32
      %c0_i32_46 = arith.constant 0 : i32
      %c0_i32_47 = arith.constant 0 : i32
      %67 = tpu.memref_slice %arg3[%c0_i32_46, %c0_i32_47] : memref<1000x128xf32, #tpu.memory_space<any>> -> memref<1x128xf32, #tpu.memory_space<any>>
      %c0_i32_48 = arith.constant 0 : i32
      %c0_i32_49 = arith.constant 0 : i32
      %68 = tpu.memref_slice %arg9[%c0_i32_48, %c0_i32_49] : memref<16x128xf32, #tpu.memory_space<vmem>> -> memref<1x128xf32, #tpu.memory_space<vmem>>
      %69 = tpu.memref_slice %arg10[%c5_i32] : memref<8x!tpu.dma_semaphore, #tpu.memory_space<semaphore_mem>> -> memref<1x!tpu.dma_semaphore, #tpu.memory_space<semaphore_mem>>
      %70 = tpu.memref_squeeze %69 : memref<1x!tpu.dma_semaphore, #tpu.memory_space<semaphore_mem>> -> memref<!tpu.dma_semaphore, #tpu.memory_space<semaphore_mem>>
      tpu.wait_dma2 semaphore(%70 : memref<!tpu.dma_semaphore, #tpu.memory_space<semaphore_mem>>) src(%67 : memref<1x128xf32, #tpu.memory_space<any>>) dst(%68 : memref<1x128xf32, #tpu.memory_space<vmem>>)
      %c6_i32 = arith.constant 6 : i32
      %c0_i32_50 = arith.constant 0 : i32
      %c0_i32_51 = arith.constant 0 : i32
      %71 = tpu.memref_slice %arg3[%c0_i32_50, %c0_i32_51] : memref<1000x128xf32, #tpu.memory_space<any>> -> memref<1x128xf32, #tpu.memory_space<any>>
      %c0_i32_52 = arith.constant 0 : i32
      %c0_i32_53 = arith.constant 0 : i32
      %72 = tpu.memref_slice %arg9[%c0_i32_52, %c0_i32_53] : memref<16x128xf32, #tpu.memory_space<vmem>> -> memref<1x128xf32, #tpu.memory_space<vmem>>
      %73 = tpu.memref_slice %arg10[%c6_i32] : memref<8x!tpu.dma_semaphore, #tpu.memory_space<semaphore_mem>> -> memref<1x!tpu.dma_semaphore, #tpu.memory_space<semaphore_mem>>
      %74 = tpu.memref_squeeze %73 : memref<1x!tpu.dma_semaphore, #tpu.memory_space<semaphore_mem>> -> memref<!tpu.dma_semaphore, #tpu.memory_space<semaphore_mem>>
      tpu.wait_dma2 semaphore(%74 : memref<!tpu.dma_semaphore, #tpu.memory_space<semaphore_mem>>) src(%71 : memref<1x128xf32, #tpu.memory_space<any>>) dst(%72 : memref<1x128xf32, #tpu.memory_space<vmem>>)
      %c7_i32 = arith.constant 7 : i32
      %c0_i32_54 = arith.constant 0 : i32
      %c0_i32_55 = arith.constant 0 : i32
      %75 = tpu.memref_slice %arg3[%c0_i32_54, %c0_i32_55] : memref<1000x128xf32, #tpu.memory_space<any>> -> memref<1x128xf32, #tpu.memory_space<any>>
      %c0_i32_56 = arith.constant 0 : i32
      %c0_i32_57 = arith.constant 0 : i32
      %76 = tpu.memref_slice %arg9[%c0_i32_56, %c0_i32_57] : memref<16x128xf32, #tpu.memory_space<vmem>> -> memref<1x128xf32, #tpu.memory_space<vmem>>
      %77 = tpu.memref_slice %arg10[%c7_i32] : memref<8x!tpu.dma_semaphore, #tpu.memory_space<semaphore_mem>> -> memref<1x!tpu.dma_semaphore, #tpu.memory_space<semaphore_mem>>
      %78 = tpu.memref_squeeze %77 : memref<1x!tpu.dma_semaphore, #tpu.memory_space<semaphore_mem>> -> memref<!tpu.dma_semaphore, #tpu.memory_space<semaphore_mem>>
      tpu.wait_dma2 semaphore(%78 : memref<!tpu.dma_semaphore, #tpu.memory_space<semaphore_mem>>) src(%75 : memref<1x128xf32, #tpu.memory_space<any>>) dst(%76 : memref<1x128xf32, #tpu.memory_space<vmem>>)
    }
    %c0 = arith.constant 0 : index
    %c0_4 = arith.constant 0 : index
    %4 = vector.load %arg9[%c0, %c0_4] : memref<16x128xf32, #tpu.memory_space<vmem>>, vector<16x128xf32>
    %c0_5 = arith.constant 0 : index
    %c0_6 = arith.constant 0 : index
    %5 = vector.load %arg4[%c0_5, %c0_6] : memref<16x128xf32, #tpu.memory_space<vmem>>, vector<16x128xf32>
    %6 = arith.addf %4, %5 : vector<16x128xf32>
    %c0_7 = arith.constant 0 : index
    %c0_8 = arith.constant 0 : index
    %c0_9 = arith.constant 0 : index
    %7 = vector.load %arg5[%c0_7, %c0_8, %c0_9] : memref<1x16x1xi32, #tpu.memory_space<vmem>>, vector<1x16x1xi32>
    %8 = vector.shape_cast %7 : vector<1x16x1xi32> to vector<16x1xi32>
    %c0_10 = arith.constant 0 : index
    %c0_11 = arith.constant 0 : index
    %9 = vector.load %arg6[%c0_10, %c0_11] : memref<2x128xf32, #tpu.memory_space<vmem>>, vector<2x128xf32>
    %10 = vector.extract_strided_slice %9 {offsets = [1, 0], sizes = [1, 128], strides = [1, 1]} : vector<2x128xf32> to vector<1x128xf32>
    %11 = vector.shape_cast %10 : vector<1x128xf32> to vector<1x128xf32>
    %12 = vector.broadcast %11 : vector<1x128xf32> to vector<16x128xf32>
    %13 = vector.extract_strided_slice %9 {offsets = [0, 0], sizes = [1, 128], strides = [1, 1]} : vector<2x128xf32> to vector<1x128xf32>
    %14 = vector.shape_cast %13 : vector<1x128xf32> to vector<1x128xf32>
    %15 = vector.broadcast %14 : vector<1x128xf32> to vector<16x128xf32>
    %c0_i32_12 = arith.constant 0 : i32
    %16 = vector.broadcast %c0_i32_12 : i32 to vector<16x1xi32>
    %17 = arith.cmpi eq, %8, %16 : vector<16x1xi32>
    %18 = vector.shape_cast %17 : vector<16x1xi1> to vector<16x1xi1>
    %19 = vector.broadcast %18 : vector<16x1xi1> to vector<16x128xi1>
    %20 = arith.select %19, %15, %12 : vector<16x128xi1>, vector<16x128xf32>
    %21 = arith.addf %6, %20 : vector<16x128xf32>
    %cst = arith.constant dense<0.000000e+00> : vector<16xf32>
    %22 = vector.multi_reduction <add>, %21, %cst [1] : vector<16x128xf32> to vector<16xf32>
    %23 = vector.shape_cast %22 : vector<16xf32> to vector<16x1xf32>
    %cst_13 = arith.constant 1.280000e+02 : f32
    %24 = vector.broadcast %cst_13 : f32 to vector<16x1xf32>
    %25 = arith.divf %23, %24 : vector<16x1xf32>
    %26 = vector.broadcast %25 : vector<16x1xf32> to vector<16x128xf32>
    %27 = arith.subf %21, %26 : vector<16x128xf32>
    %28 = arith.mulf %27, %27 : vector<16x128xf32>
    %cst_14 = arith.constant dense<0.000000e+00> : vector<16xf32>
    %29 = vector.multi_reduction <add>, %28, %cst_14 [1] : vector<16x128xf32> to vector<16xf32>
    %30 = vector.shape_cast %29 : vector<16xf32> to vector<16x1xf32>
    %cst_15 = arith.constant 1.280000e+02 : f32
    %31 = vector.broadcast %cst_15 : f32 to vector<16x1xf32>
    %32 = arith.divf %30, %31 : vector<16x1xf32>
    %c0_16 = arith.constant 0 : index
    %c0_17 = arith.constant 0 : index
    %33 = vector.load %arg7[%c0_16, %c0_17] : memref<2x128xf32, #tpu.memory_space<vmem>>, vector<1x128xf32>
    %c1 = arith.constant 1 : index
    %c0_18 = arith.constant 0 : index
    %34 = vector.load %arg7[%c1, %c0_18] : memref<2x128xf32, #tpu.memory_space<vmem>>, vector<1x128xf32>
    %cst_19 = arith.constant 9.99999996E-13 : f32
    %35 = vector.broadcast %cst_19 : f32 to vector<16x1xf32>
    %36 = arith.addf %32, %35 : vector<16x1xf32>
    %37 = math.rsqrt %36 : vector<16x1xf32>
    %38 = vector.broadcast %37 : vector<16x1xf32> to vector<16x128xf32>
    %39 = arith.mulf %27, %38 : vector<16x128xf32>
    %40 = vector.broadcast %33 : vector<1x128xf32> to vector<16x128xf32>
    %41 = arith.mulf %39, %40 : vector<16x128xf32>
    %42 = vector.broadcast %34 : vector<1x128xf32> to vector<16x128xf32>
    %43 = arith.addf %41, %42 : vector<16x128xf32>
    %c0_20 = arith.constant 0 : index
    %c0_21 = arith.constant 0 : index
    %c0_22 = arith.constant 0 : index
    %44 = vector.load %arg8[%c0_20, %c0_21, %c0_22] : memref<1x16x128xf32, #tpu.memory_space<vmem>>, vector<1x16x128xf32>
    %45 = vector.shape_cast %44 : vector<1x16x128xf32> to vector<16x128xf32>
    %46 = vector.shape_cast %43 : vector<16x128xf32> to vector<1x16x128xf32>
    tpu.vector_store %arg8[%c0_20, %c0_21, %c0_22], %46 {strides = array<i32>} : memref<1x16x128xf32, #tpu.memory_space<vmem>>, vector<1x16x128xf32>,
    return
  }
  func.func @transform_1(%arg0: i32, %arg1: i32, %arg2: memref<2x32xi32, #tpu.memory_space<smem>>) -> (i32, i32) {
    %c0_i32 = arith.constant 0 : i32
    %c0_i32_0 = arith.constant 0 : i32
    return %arg0, %c0_i32 : i32, i32
  }
  func.func @transform_2(%arg0: i32, %arg1: i32, %arg2: memref<2x32xi32, #tpu.memory_space<smem>>) -> (i32, i32, i32) {
    %c0_i32 = arith.constant 0 : i32
    %c0_i32_0 = arith.constant 0 : i32
    return %arg1, %arg0, %c0_i32 : i32, i32, i32
  }
  func.func @transform_3(%arg0: i32, %arg1: i32, %arg2: memref<2x32xi32, #tpu.memory_space<smem>>) -> (i32, i32) {
    %c0_i32 = arith.constant 0 : i32
    %c0_i32_0 = arith.constant 0 : i32
    %c0_i32_1 = arith.constant 0 : i32
    return %c0_i32, %c0_i32_0 : i32, i32
  }
  func.func @transform_4(%arg0: i32, %arg1: i32, %arg2: memref<2x32xi32, #tpu.memory_space<smem>>) -> (i32, i32) {
    %c0_i32 = arith.constant 0 : i32
    %c0_i32_0 = arith.constant 0 : i32
    %c0_i32_1 = arith.constant 0 : i32
    return %c0_i32, %c0_i32_0 : i32, i32
  }
  func.func @transform_5(%arg0: i32, %arg1: i32, %arg2: memref<2x32xi32, #tpu.memory_space<smem>>) -> (i32, i32, i32) {
    %c0_i32 = arith.constant 0 : i32
    %c0_i32_0 = arith.constant 0 : i32
    return %arg1, %arg0, %c0_i32 : i32, i32, i32
  }
}

</mosaic_0001>

<bundles_post_ra>
// kernel: bert_embeddings.1
= control target key start
LH: loop header
LB: loop body
LE: loop exit
PB: predicated region body
PF: predicated region fallthrough
CT: control target
= control target key end

     0   :  { %s1419_s0 = inlined_call_operand.vmem [shape: s32[2,32], index: 0, kind: input, shape index: {}]   ;;  %s1420_s1 = inlined_call_operand.hbm [shape: f32[1000,128], index: 1, kind: input, shape index: {}]   ;;  %s1421_s2 = inlined_call_operand.vmem [shape: f32[32,128], index: 2, kind: input, shape index: {}]   ;;  %s1422_s3 = inlined_call_operand.vmem [shape: s32[2,32,1], index: 3, kind: input, shape index: {}]   ;;  %s1423_s4 = inlined_call_operand.vmem [shape: f32[2,128], index: 4, kind: input, shape index: {}]   ;;  %s1424_s5 = inlined_call_operand.vmem [shape: f32[2,128], index: 5, kind: input, shape index: {}]   ;;  %s1425_s6 = inlined_call_operand.vmem [shape: f32[2,32,128], index: 6, kind: output, shape index: {}]  }
   0x1   :  { %1430 = sst [smem:[#allocation39_spill]] %s1421_s2  ;;  %s11_s23 = sshll.u32 %s1419_s0, 4  ;;  %s12_s23 = int_to_ptr.vmem [resolvable:$true] %s11_s23 }
   0x2   :  { %1431 = sst [smem:[#allocation40_spill]] %s1422_s3  ;;  %s894_s24 = scalar_lea.vmem %s12_s23, 32 }
   0x3   :  { %1432 = sst [smem:[#allocation41_spill]] %s1425_s6  ;;  %p895_p0 = scmp.ne.s32.totalorder %s12_s23, %s894_s24 }
   0x4   :  { %p899_p1 = scmp.lt.s32.totalorder %s12_s23, %s12_s23  ;;  %p900_p2 = scmp.lt.s32.totalorder %s894_s24, %s894_s24 }
   0x6   :  { %p901_p3 = por %p900_p2, %p899_p1 }
   0x8   :  { %p902_p4 = pnand %p901_p3, %p895_p0 }
   0xa   :  { %905 = shalt.err (!%p902_p4)  }
   0xb   :  { %s1156_s25 = smov [#allocation5]  }
   0xc   :  { %14 = dma.vmem_to_smem %s12_s23, 32, %s1156_s25, [#allocation4] }
   0xd   :  { %1110 = dma.done.wait [#allocation4], 32 }
   0xe   :  { %1111 = vsyncadd [#allocation4], 4294967264 }
   0xf   :  { %16 = sfence }
  0x10   :  { %s1197_s26 = smov 0   ;;  %s1199_s27 = smov 0  }
  0x11   :  { %s1201_s28 = smov 0   ;;  %s1203_s0 = smov 0  }
  0x12   :  { %s1205_s29 = smov 0  }
  0x13 LB: > { %1433 = sst [smem:[#allocation33_spill]] %s1134_s27  ;;  %s31_s30 = sadd.s32 1, %s1138_s28  ;;  %s1146_s29 = sphi %s1205_s29, %s22_s29   ;;  %s1142_s0 = sphi %s1203_s0, %s1449_s0   ;;  %s1138_s28 = sphi %s1201_s28, %s1448_s28   ;;  %s1134_s27 = sphi %s1199_s27, %s1447_s27   ;;  %s1130_s26 = sphi %s1197_s26, %s1446_s26  }
  0x14   : > { %1434 = sst [smem:[#allocation34_spill]] %s1138_s28  ;;  %s34_s7 = sadd.s32 1, %s1142_s0 }
  0x15   : > { %1435 = sst [smem:[#allocation35_spill]] %s1142_s0  ;;  %p32_p5 = scmp.ge.s32.totalorder %s31_s30, 2 }
  0x16   : > { %1436 = sst [smem:[#allocation36_spill]] %s1146_s29  ;;  %p785_p6 = scmp.ge.s32.totalorder %s1146_s29, 1 }
  0x17   : > { %p202_p7 = scmp.lt.s32.totalorder %s1146_s29, 5  ;;  %s1451_s30 = smov (%p32_p5, %s31_s30), 0 }
  0x18   : > { %1437 = sst [smem:[#allocation37_spill]] %s1451_s30  ;;  %s1453_s7 = smov (!%p32_p5, %s34_s7), %s1142_s0 }
  0x19   : > { %p203_p8 = pnand %p785_p6, %p202_p7  ;;  %p36_p9 = scmp.ge.s32.totalorder %s1453_s7, 2 }
  0x1a   : > { %s786_s8 = sshll.u32 (!%p203_p8), %s1134_s27, 1  ;;  %p248_p10 = scmp.lt.s32.totalorder (!%p203_p8), %s1130_s26, 1 }
  0x1b   : > { %s1455_s7 = smov (%p36_p9, %s1453_s7), 0  ;;  %206 = sbr.rel (%p203_p8) target bundleno = 698 (0x2ba), region = 36 }
  0x1c   : > { %1438 = sst [smem:[#allocation38_spill]] %s1455_s7  ;;  %p242_p11 = scmp.lt.s32.totalorder (!%p203_p8), %s786_s8, 3 }
  0x1d   : > { %s1439_s2 = sld [smem:[#allocation39_spill]] (!%p203_p8)  ;;  %s1250_s24 = smov (!%p203_p8), 0  }
  0x1e   : > { %s1440_s3 = sld [smem:[#allocation40_spill]] (!%p203_p8) }
  0x1f   : > { %s1441_s6 = sld [smem:[#allocation41_spill]] (!%p203_p8) }
  0x20   : > { %s249_s10 = scalar_select %p248_p10, %s1130_s26, 1 }
  0x21   : > { %s1457_s8 = smov (!%p242_p11, %s786_s8), 3 }
  0x22   : > { %s789_s11 = sshll.u32 %s249_s10, 2  ;;  %s787_s12 = sshll.u32 %s1457_s8, 3 }
  0x23   : > { %s253_s13 = sadd.s32 %s789_s11, %s1457_s8  ;;  %s1238_s16 = scalar_lea.vmem %s1439_s2, %s787_s12 }
  0x24   : > { %s790_s17 = sshll.u32 %s253_s13, 3 }
  0x25   : > { %s1243_s20 = scalar_lea.vmem %s1440_s3, %s790_s17  ;;  %s1248_s23 = scalar_lea.vmem %s1441_s6, %s790_s17 }
  0x26 LB: >> { %s1442_s27 = sld [smem:[#allocation33_spill]]  ;;  %s795_s25 = sshll.u32 %s1150_s24, 3  ;;  %s1150_s24 = sphi %s1250_s24, %s273_s24  }
  0x27   : >> { %s1263_s13 = scalar_lea.vmem [#allocation2], %s795_s25 }
  0x28   : >> { %s294_s14 = sshll.u32 %s1263_s13, 4  ;;  %s694_s3 = scalar_lea.vmem %s1263_s13, 1 [#allocation2]  ;;  %s1266_s14 = int_to_ptr.vmem [resolvable:$true] %s294_s14 }
  0x2c   : >> { %s1443_s9 = sshll.u32 %s1442_s27, 4 }
  0x2d   : >> { %s1258_s8 = sadd.s32 %s795_s25, %s1443_s9  ;;  %s319_s25 = sshll.u32 %s694_s3, 4  ;;  %s1273_s25 = int_to_ptr.vmem [resolvable:$true] %s319_s25 }
  0x2e   : >> { %s276_s10 = sshra.s32 %s1258_s8, 7  ;;  %s281_s11 = sand.u32 127, %s1258_s8 }
  0x2f   : >> { %s278_s12 = sadd.s32 %s1130_s26, %s276_s10  ;;  %s298_s18 = sadd.s32 1, %s1258_s8 }
  0x30   : >> { %s796_s15 = sshll.u32 %s278_s12, 7  ;;  %s299_s21 = sshra.s32 %s298_s18, 7 }
  0x31   : >> { %s282_s17 = sadd.s32 %s796_s15, %s281_s11  ;;  %s301_s22 = sadd.s32 %s1130_s26, %s299_s21 }
  0x32   : >> { %s283_s19 = sld [smem:[#allocation5 + %s282_s17]]  ;;  %s304_s9 = sand.u32 127, %s298_s18 }
  0x33   : >> { %s798_s2 = sshll.u32 %s301_s22, 7  ;;  %s323_s27 = sadd.s32 2, %s1258_s8 }
  0x34   : >> { %s305_s10 = sadd.s32 %s798_s2, %s304_s9  ;;  %s324_s30 = sshra.s32 %s323_s27, 7 }
  0x35   : >> { %s1271_s6 = sld [smem:[#allocation5 + %s305_s10]]  ;;  %s326_s17 = sadd.s32 %s1130_s26, %s324_s30 }
  0x36   : >> { %s1284_s2 = scalar_lea.hbm %s1420_s1, 16000 }
  0x38   : >> { %s797_s12 = sshll.u32 %s283_s19, 4 }
  0x39   : >> { %s285_s15 = scalar_lea.hbm %s1420_s1, %s797_s12 }
  0x3a   : >> { %s906_s28 = scalar_lea.hbm %s285_s15, 16  ;;  %p909_p13 = scmp.lt.s32.totalorder %s285_s15, %s1420_s1 }
  0x3b   : >> { %p907_p12 = scmp.ne.s32.totalorder %s285_s15, %s906_s28  ;;  %p910_p0 = scmp.lt.s32.totalorder %s1284_s2, %s906_s28 }
  0x3d   : >> { %p911_p1 = por %p910_p0, %p909_p13 }
  0x3f   : >> { %p912_p2 = pnand %p911_p1, %p907_p12 }
  0x41   : >> { %915 = shalt.err (!%p912_p2)  }
  0x42   : >> { %s916_s0 = scalar_lea.vmem %s1266_s14, 16  ;;  %s1157_s30 = smov [#allocation2]  }
  0x43   : >> { %p917_p3 = scmp.ne.s32.totalorder %s1266_s14, %s916_s0  ;;  %s918_s19 = sshll.u32 %s1157_s30, 4  ;;  %s1292_s19 = int_to_ptr.vmem [resolvable:$false] %s918_s19 }
  0x44   : >> { %s1295_s22 = scalar_lea.vmem %s1292_s19, 256  ;;  %p921_p4 = scmp.lt.s32.totalorder %s1266_s14, %s1292_s19 }
  0x45   : >> { %p922_p5 = scmp.lt.s32.totalorder %s1295_s22, %s916_s0 }
  0x47   : >> { %p923_p6 = por %p922_p5, %p921_p4 }
  0x49   : >> { %p924_p7 = pnand %p923_p6, %p917_p3 }
  0x4b   : >> { %927 = shalt.err (!%p924_p7)  }
  0x4c   : >> { %297 = dma.hbm_to_vmem [thread:$0]  %s285_s15, 16, %s1266_s14, [#allocation3] }
  0x4d   : >> { %s801_s28 = sshll.u32 %s326_s17, 7  ;;  %s329_s10 = sand.u32 127, %s323_s27 }
  0x4e   : >> { %s799_s12 = sshll.u32 %s1271_s6, 4  ;;  %s330_s11 = sadd.s32 %s801_s28, %s329_s10 }
  0x4f   : >> { %s309_s3 = scalar_lea.hbm %s1420_s1, %s799_s12  ;;  %s331_s9 = sld [smem:[#allocation5 + %s330_s11]] }
  0x50   : >> { %s928_s30 = scalar_lea.hbm %s309_s3, 16  ;;  %p931_p9 = scmp.lt.s32.totalorder %s309_s3, %s1420_s1 }
  0x51   : >> { %p929_p8 = scmp.ne.s32.totalorder %s309_s3, %s928_s30  ;;  %p932_p10 = scmp.lt.s32.totalorder %s1284_s2, %s928_s30 }
  0x53   : >> { %p933_p11 = por %p932_p10, %p931_p9 }
  0x55   : >> { %p934_p12 = pnand %p933_p11, %p929_p8 }
  0x57   : >> { %937 = shalt.err (!%p934_p12)  }
  0x58   : >> { %s938_s6 = scalar_lea.vmem %s1273_s25, 16  ;;  %p943_p0 = scmp.lt.s32.totalorder %s1273_s25, %s1292_s19 }
  0x59   : >> { %p939_p13 = scmp.ne.s32.totalorder %s1273_s25, %s938_s6  ;;  %p944_p1 = scmp.lt.s32.totalorder %s1295_s22, %s938_s6 }
  0x5b   : >> { %p945_p2 = por %p944_p1, %p943_p0 }
  0x5d   : >> { %p946_p3 = pnand %p945_p2, %p939_p13 }
  0x5f   : >> { %949 = shalt.err (!%p946_p3)  }
  0x60   : >> { %322 = dma.hbm_to_vmem [thread:$0]  %s309_s3, 16, %s1273_s25, [#allocation3 + $0x1] }
  0x61   : >> { %s1444_s27 = scalar_lea.vmem %s1263_s13, 2 [#allocation2]  ;;  %s348_s14 = sadd.s32 3, %s1258_s8 }
  0x62   : >> { %s344_s7 = sshll.u32 %s1444_s27, 4  ;;  %s349_s15 = sshra.s32 %s348_s14, 7  ;;  %s345_s7 = int_to_ptr.vmem [resolvable:$true] %s344_s7 }
  0x63   : >> { %s351_s17 = sadd.s32 %s1130_s26, %s349_s15  ;;  %s354_s28 = sand.u32 127, %s348_s14 }
  0x64   : >> { %s804_s10 = sshll.u32 %s351_s17, 7  ;;  %s704_s12 = scalar_lea.vmem %s1263_s13, 3 [#allocation2] }
  0x65   : >> { %s802_s11 = sshll.u32 %s331_s9, 4  ;;  %s355_s18 = sadd.s32 %s804_s10, %s354_s28 }
  0x66   : >> { %s334_s0 = scalar_lea.hbm %s1420_s1, %s802_s11  ;;  %s356_s6 = sld [smem:[#allocation5 + %s355_s18]] }
  0x67   : >> { %s950_s29 = scalar_lea.hbm %s334_s0, 16  ;;  %p953_p5 = scmp.lt.s32.totalorder %s334_s0, %s1420_s1 }
  0x68   : >> { %p951_p4 = scmp.ne.s32.totalorder %s334_s0, %s950_s29  ;;  %p954_p6 = scmp.lt.s32.totalorder %s1284_s2, %s950_s29 }
  0x6a   : >> { %p955_p7 = por %p954_p6, %p953_p5 }
  0x6c   : >> { %p956_p8 = pnand %p955_p7, %p951_p4 }
  0x6e   : >> { %959 = shalt.err (!%p956_p8)  }
  0x6f   : >> { %s960_s27 = scalar_lea.vmem %s345_s7, 16  ;;  %p965_p10 = scmp.lt.s32.totalorder %s345_s7, %s1292_s19 }
  0x70   : >> { %p961_p9 = scmp.ne.s32.totalorder %s345_s7, %s960_s27  ;;  %p966_p11 = scmp.lt.s32.totalorder %s1295_s22, %s960_s27 }
  0x72   : >> { %p967_p12 = por %p966_p11, %p965_p10 }
  0x74   : >> { %p968_p13 = pnand %p967_p12, %p961_p9 }
  0x76   : >> { %971 = shalt.err (!%p968_p13)  }
  0x77   : >> { %347 = dma.hbm_to_vmem [thread:$0]  %s334_s0, 16, %s345_s7, [#allocation3 + $0x2] }
  0x78   : >> { %s369_s9 = sshll.u32 %s704_s12, 4  ;;  %s373_s14 = sadd.s32 4, %s1258_s8  ;;  %s370_s9 = int_to_ptr.vmem [resolvable:$true] %s369_s9 }
  0x79   : >> { %s374_s29 = sshra.s32 %s373_s14, 7  ;;  %s379_s17 = sand.u32 127, %s373_s14 }
  0x7a   : >> { %s376_s15 = sadd.s32 %s1130_s26, %s374_s29  ;;  %s709_s10 = scalar_lea.vmem %s1263_s13, 4 [#allocation2] }
  0x7b   : >> { %s807_s28 = sshll.u32 %s376_s15, 7  ;;  %s805_s11 = sshll.u32 %s356_s6, 4 }
  0x7c   : >> { %s380_s18 = sadd.s32 %s807_s28, %s379_s17  ;;  %s359_s25 = scalar_lea.hbm %s1420_s1, %s805_s11 }
  0x7d   : >> { %s381_s3 = sld [smem:[#allocation5 + %s380_s18]]  ;;  %s972_s7 = scalar_lea.hbm %s359_s25, 16 }
  0x7e   : >> { %p973_p0 = scmp.ne.s32.totalorder %s359_s25, %s972_s7  ;;  %p975_p1 = scmp.lt.s32.totalorder %s359_s25, %s1420_s1 }
  0x7f   : >> { %p976_p2 = scmp.lt.s32.totalorder %s1284_s2, %s972_s7 }
  0x81   : >> { %p977_p3 = por %p976_p2, %p975_p1 }
  0x83   : >> { %p978_p4 = pnand %p977_p3, %p973_p0 }
  0x85   : >> { %981 = shalt.err (!%p978_p4)  }
  0x86   : >> { %s982_s12 = scalar_lea.vmem %s370_s9, 16  ;;  %p987_p6 = scmp.lt.s32.totalorder %s370_s9, %s1292_s19 }
  0x87   : >> { %p983_p5 = scmp.ne.s32.totalorder %s370_s9, %s982_s12  ;;  %p988_p7 = scmp.lt.s32.totalorder %s1295_s22, %s982_s12 }
  0x89   : >> { %p989_p8 = por %p988_p7, %p987_p6 }
  0x8b   : >> { %p990_p9 = pnand %p989_p8, %p983_p5 }
  0x8d   : >> { %993 = shalt.err (!%p990_p9)  }
  0x8e   : >> { %372 = dma.hbm_to_vmem [thread:$0]  %s359_s25, 16, %s370_s9, [#allocation3 + $0x3] }
  0x8f   : >> { %s394_s6 = sshll.u32 %s709_s10, 4  ;;  %s398_s14 = sadd.s32 5, %s1258_s8  ;;  %s395_s6 = int_to_ptr.vmem [resolvable:$true] %s394_s6 }
  0x90   : >> { %s399_s29 = sshra.s32 %s398_s14, 7  ;;  %s404_s17 = sand.u32 127, %s398_s14 }
  0x91   : >> { %s401_s15 = sadd.s32 %s1130_s26, %s399_s29  ;;  %s714_s11 = scalar_lea.vmem %s1263_s13, 5 [#allocation2] }
  0x92   : >> { %s810_s28 = sshll.u32 %s401_s15, 7  ;;  %s808_s18 = sshll.u32 %s381_s3, 4 }
  0x93   : >> { %s405_s21 = sadd.s32 %s810_s28, %s404_s17  ;;  %s384_s0 = scalar_lea.hbm %s1420_s1, %s808_s18 }
  0x94   : >> { %s406_s27 = sld [smem:[#allocation5 + %s405_s21]]  ;;  %s994_s9 = scalar_lea.hbm %s384_s0, 16 }
  0x95   : >> { %p995_p10 = scmp.ne.s32.totalorder %s384_s0, %s994_s9  ;;  %p997_p11 = scmp.lt.s32.totalorder %s384_s0, %s1420_s1 }
  0x96   : >> { %p998_p12 = scmp.lt.s32.totalorder %s1284_s2, %s994_s9 }
  0x98   : >> { %p999_p13 = por %p998_p12, %p997_p11 }
  0x9a   : >> { %p1000_p0 = pnand %p999_p13, %p995_p10 }
  0x9c   : >> { %1003 = shalt.err (!%p1000_p0)  }
  0x9d   : >> { %s1004_s10 = scalar_lea.vmem %s395_s6, 16  ;;  %p1009_p2 = scmp.lt.s32.totalorder %s395_s6, %s1292_s19 }
  0x9e   : >> { %p1005_p1 = scmp.ne.s32.totalorder %s395_s6, %s1004_s10  ;;  %p1010_p3 = scmp.lt.s32.totalorder %s1295_s22, %s1004_s10 }
  0xa0   : >> { %p1011_p4 = por %p1010_p3, %p1009_p2 }
  0xa2   : >> { %p1012_p5 = pnand %p1011_p4, %p1005_p1 }
  0xa4   : >> { %1015 = shalt.err (!%p1012_p5)  }
  0xa5   : >> { %397 = dma.hbm_to_vmem [thread:$0]  %s384_s0, 16, %s395_s6, [#allocation3 + $0x4] }
  0xa6   : >> { %s419_s3 = sshll.u32 %s714_s11, 4  ;;  %s423_s14 = sadd.s32 6, %s1258_s8  ;;  %s420_s3 = int_to_ptr.vmem [resolvable:$true] %s419_s3 }
  0xa7   : >> { %s424_s29 = sshra.s32 %s423_s14, 7  ;;  %s429_s17 = sand.u32 127, %s423_s14 }
  0xa8   : >> { %s426_s15 = sadd.s32 %s1130_s26, %s424_s29  ;;  %s719_s18 = scalar_lea.vmem %s1263_s13, 6 [#allocation2] }
  0xa9   : >> { %s813_s28 = sshll.u32 %s426_s15, 7  ;;  %s811_s21 = sshll.u32 %s406_s27, 4 }
  0xaa   : >> { %s430_s30 = sadd.s32 %s813_s28, %s429_s17  ;;  %s409_s25 = scalar_lea.hbm %s1420_s1, %s811_s21 }
  0xab   : >> { %s431_s12 = sld [smem:[#allocation5 + %s430_s30]]  ;;  %s1016_s6 = scalar_lea.hbm %s409_s25, 16 }
  0xac   : >> { %p1017_p6 = scmp.ne.s32.totalorder %s409_s25, %s1016_s6  ;;  %p1019_p7 = scmp.lt.s32.totalorder %s409_s25, %s1420_s1 }
  0xad   : >> { %p1020_p8 = scmp.lt.s32.totalorder %s1284_s2, %s1016_s6 }
  0xaf   : >> { %p1021_p9 = por %p1020_p8, %p1019_p7 }
  0xb1   : >> { %p1022_p10 = pnand %p1021_p9, %p1017_p6 }
  0xb3   : >> { %1025 = shalt.err (!%p1022_p10)  }
  0xb4   : >> { %s1026_s11 = scalar_lea.vmem %s420_s3, 16  ;;  %p1031_p12 = scmp.lt.s32.totalorder %s420_s3, %s1292_s19 }
  0xb5   : >> { %p1027_p11 = scmp.ne.s32.totalorder %s420_s3, %s1026_s11  ;;  %p1032_p13 = scmp.lt.s32.totalorder %s1295_s22, %s1026_s11 }
  0xb7   : >> { %p1033_p0 = por %p1032_p13, %p1031_p12 }
  0xb9   : >> { %p1034_p1 = pnand %p1033_p0, %p1027_p11 }
  0xbb   : >> { %1037 = shalt.err (!%p1034_p1)  }
  0xbc   : >> { %422 = dma.hbm_to_vmem [thread:$0]  %s409_s25, 16, %s420_s3, [#allocation3 + $0x5] }
  0xbd   : >> { %s444_s27 = sshll.u32 %s719_s18, 4  ;;  %s448_s14 = sadd.s32 7, %s1258_s8  ;;  %s445_s27 = int_to_ptr.vmem [resolvable:$true] %s444_s27 }
  0xbe   : >> { %s449_s29 = sshra.s32 %s448_s14, 7  ;;  %s454_s17 = sand.u32 127, %s448_s14 }
  0xbf   : >> { %s451_s15 = sadd.s32 %s1130_s26, %s449_s29  ;;  %s724_s21 = scalar_lea.vmem %s1263_s13, 7 [#allocation2] }
  0xc0   : >> { %s816_s28 = sshll.u32 %s451_s15, 7  ;;  %s814_s30 = sshll.u32 %s431_s12, 4 }
  0xc1   : >> { %s455_s7 = sadd.s32 %s816_s28, %s454_s17  ;;  %s434_s0 = scalar_lea.hbm %s1420_s1, %s814_s30 }
  0xc2   : >> { %s456_s10 = sld [smem:[#allocation5 + %s455_s7]]  ;;  %s1038_s3 = scalar_lea.hbm %s434_s0, 16 }
  0xc3   : >> { %p1039_p2 = scmp.ne.s32.totalorder %s434_s0, %s1038_s3  ;;  %p1041_p3 = scmp.lt.s32.totalorder %s434_s0, %s1420_s1 }
  0xc4   : >> { %p1042_p4 = scmp.lt.s32.totalorder %s1284_s2, %s1038_s3 }
  0xc6   : >> { %p1043_p5 = por %p1042_p4, %p1041_p3 }
  0xc8   : >> { %p1044_p6 = pnand %p1043_p5, %p1039_p2 }
  0xca   : >> { %1047 = shalt.err (!%p1044_p6)  }
  0xcb   : >> { %s1048_s8 = scalar_lea.vmem %s445_s27, 16  ;;  %p1053_p8 = scmp.lt.s32.totalorder %s445_s27, %s1292_s19 }
  0xcc   : >> { %p1049_p7 = scmp.ne.s32.totalorder %s445_s27, %s1048_s8  ;;  %p1054_p9 = scmp.lt.s32.totalorder %s1295_s22, %s1048_s8 }
  0xce   : >> { %p1055_p10 = por %p1054_p9, %p1053_p8 }
  0xd0   : >> { %p1056_p11 = pnand %p1055_p10, %p1049_p7 }
  0xd2   : >> { %1059 = shalt.err (!%p1056_p11)  }
  0xd3   : >> { %447 = dma.hbm_to_vmem [thread:$0]  %s434_s0, 16, %s445_s27, [#allocation3 + $0x6] }
  0xd4   : >> { %s469_s13 = sshll.u32 %s724_s21, 4  ;;  %s817_s18 = sshll.u32 %s456_s10, 4  ;;  %s470_s13 = int_to_ptr.vmem [resolvable:$true] %s469_s13 }
  0xd5   : >> { %s459_s29 = scalar_lea.hbm %s1420_s1, %s817_s18 }
  0xd6   : >> { %s1060_s15 = scalar_lea.hbm %s459_s29, 16  ;;  %p1063_p13 = scmp.lt.s32.totalorder %s459_s29, %s1420_s1 }
  0xd7   : >> { %p1061_p12 = scmp.ne.s32.totalorder %s459_s29, %s1060_s15  ;;  %p1064_p0 = scmp.lt.s32.totalorder %s1284_s2, %s1060_s15 }
  0xd9   : >> { %p1065_p1 = por %p1064_p0, %p1063_p13 }
  0xdb   : >> { %p1066_p2 = pnand %p1065_p1, %p1061_p12 }
  0xdd   : >> { %1069 = shalt.err (!%p1066_p2)  }
  0xde   : >> { %s1070_s30 = scalar_lea.vmem %s470_s13, 16  ;;  %p1075_p4 = scmp.lt.s32.totalorder %s470_s13, %s1292_s19 }
  0xdf   : >> { %p1071_p3 = scmp.ne.s32.totalorder %s470_s13, %s1070_s30  ;;  %p1076_p5 = scmp.lt.s32.totalorder %s1295_s22, %s1070_s30 }
  0xe1   : >> { %p1077_p6 = por %p1076_p5, %p1075_p4 }
  0xe3   : >> { %p1078_p7 = pnand %p1077_p6, %p1071_p3 }
  0xe5   : >> { %1081 = shalt.err (!%p1078_p7)  }
  0xe6   : >> { %472 = dma.hbm_to_vmem [thread:$0]  %s459_s29, 16, %s470_s13, [#allocation3 + $0x7] }
  0xe7   : >> { %s273_s24 = sadd.s32 1, %s1150_s24  }
  0xe8   : >> { %p270_p8 = scmp.ge.s32.totalorder %s273_s24, 2  }
  0xe9   : > { %s1152_s2 = smov (%p270_p8), 0  }
  0xea   : > { %272 = sbr.rel (!%p270_p8) target bundleno = 38 (0x26), region = 152 }
  0xef LB: >> { %1112 = dma.done.wait [#allocation3], 16  ;;  %s1154_s2 = sphi %s1152_s2, %s478_s2  }
  0xf0   : >> { %1113 = vsyncadd [#allocation3], 4294967280 }
  0xf1   : >> { %1114 = dma.done.wait [#allocation3 + $0x1], 16 }
  0xf2   : >> { %1115 = vsyncadd [#allocation3 + $0x1], 4294967280 }
  0xf3   : >> { %1116 = dma.done.wait [#allocation3 + $0x2], 16 }
  0xf4   : >> { %1117 = vsyncadd [#allocation3 + $0x2], 4294967280 }
  0xf5   : >> { %1118 = dma.done.wait [#allocation3 + $0x3], 16 }
  0xf6   : >> { %1119 = vsyncadd [#allocation3 + $0x3], 4294967280 }
  0xf7   : >> { %1120 = dma.done.wait [#allocation3 + $0x4], 16 }
  0xf8   : >> { %1121 = vsyncadd [#allocation3 + $0x4], 4294967280 }
  0xf9   : >> { %1122 = dma.done.wait [#allocation3 + $0x5], 16 }
  0xfa   : >> { %1123 = vsyncadd [#allocation3 + $0x5], 4294967280 }
  0xfb   : >> { %1124 = dma.done.wait [#allocation3 + $0x6], 16 }
  0xfc   : >> { %1125 = vsyncadd [#allocation3 + $0x6], 4294967280 }
  0xfd   : >> { %1126 = dma.done.wait [#allocation3 + $0x7], 16 }
  0xfe   : >> { %1127 = vsyncadd [#allocation3 + $0x7], 4294967280  ;;  %s478_s2 = sadd.s32 1, %s1154_s2  }
  0xff   : >> { %p475_p9 = scmp.ge.s32.totalorder %s478_s2, 2  }
 0x100   : > { %v509_v0 = vld [vmem:[%s1243_s20] sm:$0xff] (%p475_p9)  ;;  %v510_v1 = vld [vmem:[%s1243_s20 + $0x8] sm:$0xff] (%p475_p9)  ;;  %v1158_v2 = vmov (%p475_p9), 0   ;;  %v512_v5 = vlaneseq (%p475_p9) }
 0x101   : > { %477 = sbr.rel (!%p475_p9) target bundleno = 239 (0xef), region = 163  ;;  %889 = vset.pattern.permute.xlu0 (%p475_p9), %v1158_v2  ;;  %vm520_vm0 = vcmp.eq.s32.totalorder (%p475_p9), %v509_v0, 0  ;;  %vm521_vm1 = vcmp.eq.s32.totalorder (%p475_p9), %v510_v1, 0  ;;  %v511_v9 = vld [vmem:[%s1423_s4] sm:$0x3] (%p475_p9)  ;;  %v504_v16 = vld [vmem:[#allocation2 + $0x8] sm:$0xff] (%p475_p9) }
 0x102   : > { %v522_v3 = vsel (%p475_p9), %vm520_vm0, 1, %v1158_v2  ;;  %v523_v4 = vsel (%p475_p9), %vm521_vm1, 1, %v1158_v2  ;;  %v513_v6 = vshrl.u32 (%p475_p9), %v512_v5, 7  ;;  %v503_v10 = vld [vmem:[#allocation2] sm:$0xff] (%p475_p9)  ;;  %v506_v17 = vld [vmem:[%s1238_s16 + $0x8] sm:$0xff] (%p475_p9) }
 0x103   : > { %525 = vperm.xlu0 (%p475_p9), %889, %v522_v3   ;;  %v505_v11 = vld [vmem:[%s1238_s16] sm:$0xff] (%p475_p9)  ;;  %v508_v20 = vadd.f32 (%p475_p9), %v506_v17, %v504_v16 }
 0x104   : > { %v514_v7 = vsub.s32 (%p475_p9), 1, %v513_v6  ;;  %v518_v8 = vsub.s32 (%p475_p9), 0, %v513_v6  ;;  %v507_v14 = vadd.f32 (%p475_p9), %v505_v11, %v503_v10  ;;  %v819_v39 = vld [vmem:[%s1424_s5] ss:$0 sm:$0xff] (%p475_p9)  ;;  %v820_v41 = vld [vmem:[%s1424_s5 + $0x1] ss:$0 sm:$0xff] (%p475_p9) }
 0x106   : > { %v515_v12 = vrot.slane %v511_v9, %v514_v7  ;;  %v519_v13 = vrot.slane %v511_v9, %v518_v8 }
 0x107   : > { %528 = vperm.xlu0 %889, %v523_v4  }
 0x17e   : > { %v526_v15 = vpop.permute.xlu0 %525 }
 0x17f   : > { %vm530_vm2 = vcmp.eq.s32.totalorder %v526_v15, 1 }
 0x180   : > { %v532_v18 = vsel %vm530_vm2, %v519_v13, %v515_v12 }
 0x181   : > { %v534_v19 = vadd.f32 %v532_v18, %v507_v14 }
 0x182   : > { %v529_v21 = vpop.permute.xlu0 %528 }
 0x183   : > { %vm531_vm3 = vcmp.eq.s32.totalorder %v529_v21, 1  ;;  %536 = vadd.xlane.f32.xlu1 %v534_v19 }
 0x184   : > { %v533_v22 = vsel %vm531_vm3, %v519_v13, %v515_v12 }
 0x185   : > { %v535_v23 = vadd.f32 %v533_v22, %v508_v20 }
 0x187   : > { %538 = vadd.xlane.f32.xlu1 %v535_v23 }
 0x20c   : > { %v537_v24 = vpop.xlane.xlu1 %536 }
 0x20d   : > { %v541_v25 = vmul.f32 0.0078125, %v537_v24 }
 0x20f   : > { %v543_v26 = vsub.f32 %v534_v19, %v541_v25 }
 0x210   : > { %v539_v27 = vpop.xlane.xlu1 %538 }
 0x211   : > { %v542_v28 = vmul.f32 0.0078125, %v539_v27  ;;  %v545_v29 = vmul.f32 %v543_v26, %v543_v26 }
 0x213   : > { %v544_v30 = vsub.f32 %v535_v23, %v542_v28  ;;  %547 = vadd.xlane.f32.xlu0 %v545_v29 }
 0x215   : > { %v546_v31 = vmul.f32 %v544_v30, %v544_v30 }
 0x217   : > { %549 = vadd.xlane.f32.xlu1 %v546_v31 }
 0x29c   : > { %v548_v32 = vpop.xlane.xlu0 %547 }
 0x29d   : > { %v551_v33 = vmul.f32 0.0078125, %v548_v32 }
 0x29f   : > { %v555_v34 = vadd.f32 1e-12, %v551_v33 }
 0x2a0   : > { %v550_v35 = vpop.xlane.xlu1 %549 }
 0x2a1   : > { %890 = vrsqrt.f32 %v555_v34  ;;  %v552_v36 = vmul.f32 0.0078125, %v550_v35 }
 0x2a3   : > { %v556_v37 = vadd.f32 1e-12, %v552_v36 }
 0x2a5   : > { %892 = vrsqrt.f32 %v556_v37 }
 0x2ae   : > { %v891_v38 = vpop.eup %890 }
 0x2af   : > { %v559_v40 = vmul.f32 %v891_v38, %v543_v26 }
 0x2b1   : > { %v565_v42 = vmul.f32 %v819_v39, %v559_v40 }
 0x2b2   : > { %v893_v43 = vpop.eup %892 }
 0x2b3   : > { %v571_v44 = vadd.f32 %v820_v41, %v565_v42  ;;  %v560_v45 = vmul.f32 %v893_v43, %v544_v30 }
 0x2b5   : > { %573 = vst [vmem:[%s1248_s23] sm:$0xff] %v571_v44  ;;  %v566_v46 = vmul.f32 %v819_v39, %v560_v45 }
 0x2b7   : > { %v572_v47 = vadd.f32 %v820_v41, %v566_v46 }
 0x2b9   : > { %574 = vst [vmem:[%s1248_s23 + $0x8] sm:$0xff] %v572_v47 }
 0x2ba PF: > { %s1445_s27 = sld [smem:[#allocation36_spill]] }
 0x2bb   : > { %s1446_s26 = sld [smem:[#allocation34_spill]] }
 0x2bc   : > { %s1448_s28 = sld [smem:[#allocation37_spill]] }
 0x2bd   : > { %s1449_s0 = sld [smem:[#allocation38_spill]] }
 0x2c0   : > { %s22_s29 = sadd.s32 1, %s1445_s27   ;;  %s1447_s27 = sld [smem:[#allocation35_spill]] }
 0x2c1   : > { %p19_p10 = scmp.ge.s32.totalorder %s22_s29, 6  }
 0x2c3   :  { %21 = sbr.rel (!%p19_p10) target bundleno = 19 (0x13), region = 174 }
 0x2c8   :  { %605 = vsyncmov [#allocation3] }
 0x2cb   :  { %s606_s23 = vpop.sfrf %605 }
 0x2cc   :  { %p823_p11 = scmp.ne.s32.totalorder %s606_s23, 0 }
 0x2ce   :  { %610 = shalt.err (%p823_p11)  }
 0x2cf   :  { %612 = vsyncmov [#allocation3 + $0x1] }
 0x2d2   :  { %s613_s21 = vpop.sfrf %612 }
 0x2d3   :  { %p824_p12 = scmp.ne.s32.totalorder %s613_s21, 0 }
 0x2d5   :  { %617 = shalt.err (%p824_p12)  }
 0x2d6   :  { %619 = vsyncmov [#allocation3 + $0x2] }
 0x2d9   :  { %s620_s7 = vpop.sfrf %619 }
 0x2da   :  { %p825_p13 = scmp.ne.s32.totalorder %s620_s7, 0 }
 0x2dc   :  { %624 = shalt.err (%p825_p13)  }
 0x2dd   :  { %626 = vsyncmov [#allocation3 + $0x3] }
 0x2e0   :  { %s627_s9 = vpop.sfrf %626 }
 0x2e1   :  { %p826_p0 = scmp.ne.s32.totalorder %s627_s9, 0 }
 0x2e3   :  { %631 = shalt.err (%p826_p0)  }
 0x2e4   :  { %633 = vsyncmov [#allocation3 + $0x4] }
 0x2e7   :  { %s634_s6 = vpop.sfrf %633 }
 0x2e8   :  { %p827_p1 = scmp.ne.s32.totalorder %s634_s6, 0 }
 0x2ea   :  { %638 = shalt.err (%p827_p1)  }
 0x2eb   :  { %640 = vsyncmov [#allocation3 + $0x5] }
 0x2ee   :  { %s641_s1 = vpop.sfrf %640 }
 0x2ef   :  { %p828_p2 = scmp.ne.s32.totalorder %s641_s1, 0 }
 0x2f1   :  { %645 = shalt.err (%p828_p2)  }
 0x2f2   :  { %647 = vsyncmov [#allocation3 + $0x6] }
 0x2f5   :  { %s648_s4 = vpop.sfrf %647 }
 0x2f6   :  { %p829_p3 = scmp.ne.s32.totalorder %s648_s4, 0 }
 0x2f8   :  { %652 = shalt.err (%p829_p3)  }
 0x2f9   :  { %654 = vsyncmov [#allocation3 + $0x7] }
 0x2fc   :  { %s655_s5 = vpop.sfrf %654 }
 0x2fd   :  { %p830_p4 = scmp.ne.s32.totalorder %s655_s5, 0 }
 0x2ff   :  { %659 = shalt.err (%p830_p4)  }

</bundles_post_ra>
